<compile_context>
chip_gen: v6e
topology: v6e:2x2x1
jax: 0.10.0
libtpu: 0.0.40
codegen_flags: <defaults>
</compile_context>

<pallas_src>
import functools

import jax
import jax.numpy as jnp
from jax.experimental import pallas as pl
from jax.experimental.pallas import tpu as pltpu


# --------------------------------------------------------------------------- #
# Kernel                                                                      #
# --------------------------------------------------------------------------- #
def _dice_partial_kernel(x_ref, t_ref, inter_ref, xsum_ref, tsum_ref,
                         *, apply_sigmoid, f_valid, mask_tail):
    """Accumulate per-row partial sums of x*t, x and t over the feature axis.

    Grid = (row_blocks, feature_tiles); the feature axis is innermost and
    "arbitrary", so the three (row_block, 128) output blocks stay resident in
    VMEM across the sweep (init at j == 0, accumulate every step, written back
    to HBM when the row block changes)."""
    j = pl.program_id(1)
    rb, ft = x_ref.shape

    @pl.when(j == 0)
    def _init():
        inter_ref[...] = jnp.zeros_like(inter_ref)
        xsum_ref[...] = jnp.zeros_like(xsum_ref)
        tsum_ref[...] = jnp.zeros_like(tsum_ref)

    def _accumulate(masked):
        zero = jnp.zeros((rb, 128), jnp.float32)
        ip, xp, tp = zero, zero, zero
        if ft % 128 == 0:
            # Lane-dense path: walk the tile in 128-lane chunks; everything is
            # per-vreg VPU/EUP work (cast, sigmoid, multiply, three adds) with
            # no cross-lane reductions and no relayouting reshapes.
            # TODO(synk): optional bf16 sigmoid/multiply on v6e/v7x once a
            # small numerical drift from the torch reference is acceptable
            # (v5e has no bf16 VPU/EUP, keep f32 there).
            lane = None
            base = None
            if masked:  # only the last feature tile ever takes this branch
                lane = jax.lax.broadcasted_iota(jnp.int32, (rb, 128), 1)
                base = j * ft
            for c in range(ft // 128):
                lo = c * 128
                xc = x_ref[:, lo:lo + 128].astype(jnp.float32)
                tc = t_ref[:, lo:lo + 128].astype(jnp.float32)
                if apply_sigmoid:
                    xc = jax.nn.sigmoid(xc)
                if masked:
                    valid = (base + lo + lane) < f_valid
                    xc = jnp.where(valid, xc, 0.0)
                    tc = jnp.where(valid, tc, 0.0)
                ip = ip + xc * tc
                xp = xp + xc
                tp = tp + tc
        else:
            # Full-extent single tile whose width is not a multiple of 128
            # (small feature counts only): plain cross-lane reduction, folded
            # into lane 0 so accumulators / output stores stay lane-dense.
            x = x_ref[...].astype(jnp.float32)
            if apply_sigmoid:
                x = jax.nn.sigmoid(x)
            t = t_ref[...].astype(jnp.float32)
            lane0 = jax.lax.broadcasted_iota(jnp.int32, (rb, 128), 1) == 0
            ip = jnp.where(lane0, jnp.sum(x * t, axis=1, keepdims=True), 0.0)
            xp = jnp.where(lane0, jnp.sum(x, axis=1, keepdims=True), 0.0)
            tp = jnp.where(lane0, jnp.sum(t, axis=1, keepdims=True), 0.0)
        inter_ref[...] += ip
        xsum_ref[...] += xp
        tsum_ref[...] += tp

    if mask_tail:
        last = pl.num_programs(1) - 1

        @pl.when(j != last)
        def _full_tiles():
            _accumulate(False)

        @pl.when(j == last)
        def _tail_tile():
            _accumulate(True)
    else:
        _accumulate(False)


# --------------------------------------------------------------------------- #
# Tiling heuristics                                                           #
# --------------------------------------------------------------------------- #
def _tpu_generation():
    """(vmem_bytes_per_tensorcore, num_tensorcores) with safe fallbacks."""
    kind = ""
    try:
        kind = jax.devices()[0].device_kind.lower()
    except Exception:
        pass
    vmem = None
    try:
        vmem = int(pltpu.get_tpu_info().vmem_capacity_bytes)
    except Exception:
        pass
    is_v7 = "v7" in kind
    if vmem is None:
        vmem = 64 * 1024 * 1024            # conservative (v7x per-TC VMEM)
    if is_v7:
        # get_tpu_info may report per-chip capacity; per-TC VMEM is 64 MiB.
        vmem = min(vmem, 64 * 1024 * 1024)
    return vmem, (2 if is_v7 else 1)


def _pick_densification(n, f, target_rows=64, min_fk=1024):
    """Reshape (N, F) -> (N*k, F//k); the k sub-rows are re-summed afterwards.

    Prefer sublane-aligned row counts (r % 8 == 0 avoids (8,128) padding waste
    in HBM/VMEM/vregs) and enough rows per block for multi-MiB grid steps,
    without starving the lane dimension."""
    best_k, best_score = 1, None
    for k in range(1, min(f, 4096) + 1):
        if f % k:
            continue
        r, fk = n * k, f // k
        aligned = (r % 8 == 0)
        lane_rich = (fk >= min_fk) or (k == 1)
        useful_rows = min(r, target_rows) if (lane_rich or r <= 8) else 0
        score = (aligned, useful_rows, fk)
        if best_score is None or score > best_score:
            best_score, best_k = score, k
    return best_k


def _pick_row_block(r, num_cores):
    """Rows per grid step.

    * row_block <= 64 keeps the three (row_block, 128) f32 accumulators
      register-resident inside the chunk loop.
    * On a 1-TC chip (v5e/v6e) we do not split otherwise — extra grid steps
      are pure overhead on a mem-bound kernel; per-step DMA size is restored
      by the feature-tile choice, which is made *after* row_block.
    * On a 2-TC chip (v7x) we split whenever possible so both cores get rows.
    """
    if r % 8 != 0:
        return r, 1                        # unaligned: single full-extent block
    rb = r
    if r > 64:
        rb = 8
        for cand in range(8, 65, 8):
            if r % cand == 0:
                rb = cand
    if num_cores >= 2 and rb == r and r > 8:
        for cand in range(8, r // 2 + 1, 8):
            if r % cand == 0:
                rb = cand                  # largest 8-aligned divisor <= r // 2
    return rb, r // rb


def _pick_feature_tile(fk, row_block, in_bytes, vmem_cap, override=None):
    """Lane extent of one grid step.

    Targets ~8 MiB of combined input per step (>=~85-90% of HBM roofline on
    every generation), stays inside a double-buffer-aware VMEM budget, keeps
    the tile a multiple of 128 lanes, and prefers an exact 128-aligned divisor
    of fk so no ragged tail (and hence no masking) exists."""
    if override is not None:
        ft = int(override)
        if ft >= fk:
            return fk
        ft = max(128, (ft // 128) * 128)
        return fk if ft >= fk else ft

    budget = max(vmem_cap // 2 - (16 << 20), 4 << 20)   # input double-buffers
    per_lane = 2 * row_block * in_bytes                  # 2 buffers x (x + t)
    budget_ft = budget // max(per_lane, 1)
    target_ft = (8 << 20) // max(row_block * in_bytes, 1)
    max_ft = 256 * 128                                   # bounds unrolled chunks

    ft = min(budget_ft, target_ft, max_ft)
    if ft >= fk:
        return fk
    ft = max(128, (ft // 128) * 128)
    if ft >= fk:
        return fk
    if fk % 128 == 0:
        # Snap to an exact divisor (no tail) unless it costs >1/3 of the tile.
        groups, gmax = fk // 128, ft // 128
        for g in range(gmax, max((2 * gmax) // 3, 1) - 1, -1):
            if groups % g == 0:
                return g * 128
    return ft


# --------------------------------------------------------------------------- #
# Wrapper                                                                     #
# --------------------------------------------------------------------------- #
def dice_loss(inputs, target, logits=True, *, smooth=1.0, feature_tile=None):
    """Pallas DiceLoss forward. inputs/target: (N, ...) e.g. NCHW."""
    n = inputs.shape[0]
    x = inputs.reshape(n, -1)       # native dtype: no wrapper upcast / HBM copy
    t = target.reshape(n, -1)
    f = x.shape[1]

    # Sublane densification (row sums are additive; re-summed in the epilogue).
    k = _pick_densification(n, f)
    r, fk = n * k, f // k
    x = x.reshape(r, fk)
    t = t.reshape(r, fk)

    vmem_cap, num_cores = _tpu_generation()
    row_block, num_row_blocks = _pick_row_block(r, num_cores)

    in_bytes = x.dtype.itemsize + t.dtype.itemsize
    feat_tile = _pick_feature_tile(fk, row_block, in_bytes, vmem_cap, feature_tile)
    num_tiles = pl.cdiv(fk, feat_tile)
    mask_tail = (fk % feat_tile) != 0
    assert not (mask_tail and feat_tile % 128 != 0)  # tails only on 128-mult tiles

    kernel = functools.partial(
        _dice_partial_kernel,
        apply_sigmoid=bool(logits),
        f_valid=fk,
        mask_tail=mask_tail,
    )

    # VMEM: double-buffered input blocks + double-buffered (row_block, 128)
    # output/accumulator blocks, plus headroom; clamp under per-TC capacity
    # (<= 56 MiB on v7x).
    needed = (2 * row_block * feat_tile * in_bytes
              + 2 * 3 * row_block * 128 * 4)
    vmem_limit = int(max(min(needed + (8 << 20), vmem_cap - (8 << 20)), 16 << 20))

    parts = pl.pallas_call(
        kernel,
        out_shape=[jax.ShapeDtypeStruct((r, 128), jnp.float32) for _ in range(3)],
        grid_spec=pltpu.PrefetchScalarGridSpec(
            num_scalar_prefetch=0,
            grid=(num_row_blocks, num_tiles),
            in_specs=[
                pl.BlockSpec((row_block, feat_tile), lambda i, j: (i, j)),
                pl.BlockSpec((row_block, feat_tile), lambda i, j: (i, j)),
            ],
            out_specs=[pl.BlockSpec((row_block, 128), lambda i, j: (i, 0))
                       for _ in range(3)],
        ),
        compiler_params=pltpu.CompilerParams(
            dimension_semantics=("parallel", "arbitrary"),
            vmem_limit_bytes=vmem_limit,
        ),
    )(x, t)

    # O(N) dice combine in plain JAX: reduce the 128 accumulator lanes and the
    # k densified sub-rows of each sample, then the scalar dice expression.
    # TODO(synk): v7x small-batch (r < 16) — add a leading "parallel"
    # feature-split grid axis so the second TensorCore is not idle; the two
    # partial columns would simply be summed here.
    inter, xsum, tsum = (p.reshape(n, -1).sum(axis=1) for p in parts)
    per_sample = 2.0 * (inter + smooth) / (xsum + tsum + smooth)
    return 1.0 - jnp.sum(per_sample) / n


# --------------------------------------------------------------------------- #
# Reference + tests                                                           #
# --------------------------------------------------------------------------- #
def _dice_loss_ref(inputs, target, logits=True, smooth=1.0):
    x = inputs.astype(jnp.float32)
    if logits:
        x = jax.nn.sigmoid(x)
    n = target.shape[0]
    xf = x.reshape(n, -1)
    tf_ = target.reshape(n, -1).astype(jnp.float32)
    inter = jnp.sum(xf * tf_, axis=1)
    per = 2.0 * (inter + smooth) / (jnp.sum(xf, axis=1) + jnp.sum(tf_, axis=1) + smooth)
    return 1.0 - jnp.sum(per) / n


if __name__ == "__main__":
    key = jax.random.PRNGKey(0)
    k1, k2 = jax.random.split(key)

    # Primary case: NCHW, as in the PyTorch module (lane-dense chunked path).
    N, C, H, W = 2, 4, 16, 16
    logits_in = jax.random.normal(k1, (N, C, H, W), dtype=jnp.float32)
    target = (jax.random.uniform(k2, (N, C, H, W)) > 0.5).astype(jnp.float32)

    loss = jax.block_until_ready(dice_loss(logits_in, target))
    ref = _dice_loss_ref(logits_in, target)
    assert jnp.allclose(loss, ref, atol=1e-5, rtol=1e-5), (loss, ref)

    # Multi-tile sweep with a ragged tail masked only on the last tile.
    k3, k4 = jax.random.split(k2)
    N2, C2, H2, W2 = 16, 3, 10, 10               # F = 300, not 128-aligned
    logits2 = jax.random.normal(k3, (N2, C2, H2, W2), dtype=jnp.float32)
    target2 = (jax.random.uniform(k4, (N2, C2, H2, W2)) > 0.5).astype(jnp.float32)
    ref2 = _dice_loss_ref(logits2, target2)

    loss2 = jax.block_until_ready(dice_loss(logits2, target2, feature_tile=128))
    assert jnp.allclose(loss2, ref2, atol=1e-5, rtol=1e-5), (loss2, ref2)

    # Single full-extent tile whose width is not a multiple of 128 (fallback).
    loss2b = jax.block_until_ready(dice_loss(logits2, target2))
    assert jnp.allclose(loss2b, ref2, atol=1e-5, rtol=1e-5), (loss2b, ref2)

    # logits=False path (inputs already probabilities).
    probs = jax.nn.sigmoid(logits_in)
    loss3 = jax.block_until_ready(dice_loss(probs, target, logits=False))
    ref3 = _dice_loss_ref(probs, target, logits=False)
    assert jnp.allclose(loss3, ref3, atol=1e-5, rtol=1e-5), (loss3, ref3)

    print("KERNEL_OK")
</pallas_src>

<mosaic_0001>
module attributes {stable_mosaic.version = 11 : i64} {
  func.func @_dice_partial_kernel(%arg0: i32, %arg1: i32, %arg2: memref<8x256xf32, #tpu.memory_space<vmem>>, %arg3: memref<8x256xf32, #tpu.memory_space<vmem>>, %arg4: memref<8x128xf32, #tpu.memory_space<vmem>>, %arg5: memref<8x128xf32, #tpu.memory_space<vmem>>, %arg6: memref<8x128xf32, #tpu.memory_space<vmem>>) attributes {dimension_semantics = [#tpu.dimension_semantics<parallel>, #tpu.dimension_semantics<arbitrary>], iteration_bounds = array<i64: 1, 1>, scalar_prefetch = 0 : i64, scratch_operands = 0 : i64, tpu.core_type = #tpu.core_type<tc>, window_params = [{transform_indices = @transform_0, window_bounds = array<i64: 8, 256>}, {transform_indices = @transform_1, window_bounds = array<i64: 8, 256>}, {transform_indices = @transform_2, window_bounds = array<i64: 8, 128>}, {transform_indices = @transform_3, window_bounds = array<i64: 8, 128>}, {transform_indices = @transform_4, window_bounds = array<i64: 8, 128>}]} {
    %c0_i32 = arith.constant 0 : i32
    %0 = arith.cmpi eq, %arg1, %c0_i32 : i32
    %1 = arith.extui %0 : i1 to i32
    %c0_i32_0 = arith.constant 0 : i32
    %2 = arith.cmpi ne, %1, %c0_i32_0 : i32
    scf.if %2 {
      %cst_21 = arith.constant 0.000000e+00 : f32
      %35 = vector.broadcast %cst_21 : f32 to vector<8x128xf32>
      %c0_22 = arith.constant 0 : index
      %c0_23 = arith.constant 0 : index
      %36 = vector.load %arg4[%c0_22, %c0_23] : memref<8x128xf32, #tpu.memory_space<vmem>>, vector<8x128xf32>
      tpu.vector_store %arg4[%c0_22, %c0_23], %35 {strides = array<i32>} : memref<8x128xf32, #tpu.memory_space<vmem>>, vector<8x128xf32>,
      %cst_24 = arith.constant 0.000000e+00 : f32
      %37 = vector.broadcast %cst_24 : f32 to vector<8x128xf32>
      %c0_25 = arith.constant 0 : index
      %c0_26 = arith.constant 0 : index
      %38 = vector.load %arg5[%c0_25, %c0_26] : memref<8x128xf32, #tpu.memory_space<vmem>>, vector<8x128xf32>
      tpu.vector_store %arg5[%c0_25, %c0_26], %37 {strides = array<i32>} : memref<8x128xf32, #tpu.memory_space<vmem>>, vector<8x128xf32>,
      %cst_27 = arith.constant 0.000000e+00 : f32
      %39 = vector.broadcast %cst_27 : f32 to vector<8x128xf32>
      %c0_28 = arith.constant 0 : index
      %c0_29 = arith.constant 0 : index
      %40 = vector.load %arg6[%c0_28, %c0_29] : memref<8x128xf32, #tpu.memory_space<vmem>>, vector<8x128xf32>
      tpu.vector_store %arg6[%c0_28, %c0_29], %39 {strides = array<i32>} : memref<8x128xf32, #tpu.memory_space<vmem>>, vector<8x128xf32>,
    } else {
    }
    %cst = arith.constant 0.000000e+00 : f32
    %3 = vector.broadcast %cst : f32 to vector<8x128xf32>
    %c0 = arith.constant 0 : index
    %c0_1 = arith.constant 0 : index
    %4 = vector.load %arg2[%c0, %c0_1] : memref<8x256xf32, #tpu.memory_space<vmem>>, vector<8x128xf32>
    %c0_2 = arith.constant 0 : index
    %c0_3 = arith.constant 0 : index
    %5 = vector.load %arg3[%c0_2, %c0_3] : memref<8x256xf32, #tpu.memory_space<vmem>>, vector<8x128xf32>
    %6 = arith.negf %4 : vector<8x128xf32>
    %7 = math.exp %6 : vector<8x128xf32>
    %cst_4 = arith.constant 1.000000e+00 : f32
    %8 = vector.broadcast %cst_4 : f32 to vector<8x128xf32>
    %9 = arith.addf %8, %7 : vector<8x128xf32>
    %10 = arith.divf %8, %9 : vector<8x128xf32>
    %11 = arith.mulf %10, %5 : vector<8x128xf32>
    %12 = arith.addf %3, %11 : vector<8x128xf32>
    %13 = arith.addf %3, %10 : vector<8x128xf32>
    %14 = arith.addf %3, %5 : vector<8x128xf32>
    %c0_5 = arith.constant 0 : index
    %c128 = arith.constant 128 : index
    %15 = vector.load %arg2[%c0_5, %c128] : memref<8x256xf32, #tpu.memory_space<vmem>>, vector<8x128xf32>
    %c0_6 = arith.constant 0 : index
    %c128_7 = arith.constant 128 : index
    %16 = vector.load %arg3[%c0_6, %c128_7] : memref<8x256xf32, #tpu.memory_space<vmem>>, vector<8x128xf32>
    %17 = arith.negf %15 : vector<8x128xf32>
    %18 = math.exp %17 : vector<8x128xf32>
    %cst_8 = arith.constant 1.000000e+00 : f32
    %19 = vector.broadcast %cst_8 : f32 to vector<8x128xf32>
    %20 = arith.addf %19, %18 : vector<8x128xf32>
    %21 = arith.divf %19, %20 : vector<8x128xf32>
    %22 = arith.mulf %21, %16 : vector<8x128xf32>
    %23 = arith.addf %12, %22 : vector<8x128xf32>
    %24 = arith.addf %13, %21 : vector<8x128xf32>
    %25 = arith.addf %14, %16 : vector<8x128xf32>
    %c0_9 = arith.constant 0 : index
    %c0_10 = arith.constant 0 : index
    %26 = vector.load %arg4[%c0_9, %c0_10] : memref<8x128xf32, #tpu.memory_space<vmem>>, vector<8x128xf32>
    %27 = arith.addf %26, %23 : vector<8x128xf32>
    %c0_11 = arith.constant 0 : index
    %c0_12 = arith.constant 0 : index
    %28 = vector.load %arg4[%c0_11, %c0_12] : memref<8x128xf32, #tpu.memory_space<vmem>>, vector<8x128xf32>
    tpu.vector_store %arg4[%c0_11, %c0_12], %27 {strides = array<i32>} : memref<8x128xf32, #tpu.memory_space<vmem>>, vector<8x128xf32>,
    %c0_13 = arith.constant 0 : index
    %c0_14 = arith.constant 0 : index
    %29 = vector.load %arg5[%c0_13, %c0_14] : memref<8x128xf32, #tpu.memory_space<vmem>>, vector<8x128xf32>
    %30 = arith.addf %29, %24 : vector<8x128xf32>
    %c0_15 = arith.constant 0 : index
    %c0_16 = arith.constant 0 : index
    %31 = vector.load %arg5[%c0_15, %c0_16] : memref<8x128xf32, #tpu.memory_space<vmem>>, vector<8x128xf32>
    tpu.vector_store %arg5[%c0_15, %c0_16], %30 {strides = array<i32>} : memref<8x128xf32, #tpu.memory_space<vmem>>, vector<8x128xf32>,
    %c0_17 = arith.constant 0 : index
    %c0_18 = arith.constant 0 : index
    %32 = vector.load %arg6[%c0_17, %c0_18] : memref<8x128xf32, #tpu.memory_space<vmem>>, vector<8x128xf32>
    %33 = arith.addf %32, %25 : vector<8x128xf32>
    %c0_19 = arith.constant 0 : index
    %c0_20 = arith.constant 0 : index
    %34 = vector.load %arg6[%c0_19, %c0_20] : memref<8x128xf32, #tpu.memory_space<vmem>>, vector<8x128xf32>
    tpu.vector_store %arg6[%c0_19, %c0_20], %33 {strides = array<i32>} : memref<8x128xf32, #tpu.memory_space<vmem>>, vector<8x128xf32>,
    return
  }
  func.func @transform_0(%arg0: i32, %arg1: i32) -> (i32, i32) {
    %c0_i32 = arith.constant 0 : i32
    return %arg0, %arg1 : i32, i32
  }
  func.func @transform_1(%arg0: i32, %arg1: i32) -> (i32, i32) {
    %c0_i32 = arith.constant 0 : i32
    return %arg0, %arg1 : i32, i32
  }
  func.func @transform_2(%arg0: i32, %arg1: i32) -> (i32, i32) {
    %c0_i32 = arith.constant 0 : i32
    %c0_i32_0 = arith.constant 0 : i32
    return %arg0, %c0_i32 : i32, i32
  }
  func.func @transform_3(%arg0: i32, %arg1: i32) -> (i32, i32) {
    %c0_i32 = arith.constant 0 : i32
    %c0_i32_0 = arith.constant 0 : i32
    return %arg0, %c0_i32 : i32, i32
  }
  func.func @transform_4(%arg0: i32, %arg1: i32) -> (i32, i32) {
    %c0_i32 = arith.constant 0 : i32
    %c0_i32_0 = arith.constant 0 : i32
    return %arg0, %c0_i32 : i32, i32
  }
}

</mosaic_0001>

<bundles_post_ra>
// kernel: tpu_custom_call.1
= control target key start
LH: loop header
LB: loop body
LE: loop exit
PB: predicated region body
PF: predicated region fallthrough
CT: control target
= control target key end

     0   :  { %10 = vsyncpa [#allocation3], 0  ;;  %s292_s0 = inlined_call_operand.hbm [shape: f32[8,256], index: 0, kind: input, shape index: {}]   ;;  %s293_s1 = inlined_call_operand.hbm [shape: f32[8,256], index: 1, kind: input, shape index: {}]   ;;  %s294_s2 = inlined_call_operand.hbm [shape: f32[8,128], index: 2, kind: output, shape index: {0}]   ;;  %s295_s3 = inlined_call_operand.hbm [shape: f32[8,128], index: 3, kind: output, shape index: {1}]   ;;  %s296_s4 = inlined_call_operand.hbm [shape: f32[8,128], index: 4, kind: output, shape index: {2}]  }
   0x1   :  { %11 = vsyncpa [#allocation6], 0 }
   0x2   :  { %12 = vsyncpa [#allocation4], 0 }
   0x3   :  { %13 = vsyncpa [#allocation9], 0  ;;  %s247_s15 = smov [#allocation2]   ;;  %s248_s17 = smov [#allocation5]  }
   0x4   :  { %s20_s16 = sshll.u32 %s247_s15, 4  ;;  %s30_s18 = sshll.u32 %s248_s17, 4  ;;  %s21_s16 = int_to_ptr.vmem [resolvable:$true] %s20_s16  ;;  %s31_s18 = int_to_ptr.vmem [resolvable:$true] %s30_s18 }
   0x5   :  { %s147_s19 = scalar_lea.vmem %s21_s16, 256  ;;  %p152_p1 = scmp.lt.s32.totalorder %s21_s16, %s21_s16 }
   0x6   :  { %p148_p0 = scmp.ne.s32.totalorder %s21_s16, %s147_s19  ;;  %p153_p2 = scmp.lt.s32.totalorder %s147_s19, %s147_s19 }
   0x8   :  { %p154_p3 = por %p153_p2, %p152_p1 }
   0xa   :  { %p155_p4 = pnand %p154_p3, %p148_p0 }
   0xc   :  { %158 = shalt.err (!%p155_p4)
}
   0xd   :  { %23 = dma.hbm_to_vmem [thread:$0]  %s292_s0, 256, %s21_s16, [#allocation3]  }
   0xe   :  { %s167_s22 = scalar_lea.vmem %s31_s18, 256  ;;  %p172_p6 = scmp.lt.s32.totalorder %s31_s18, %s31_s18 }
   0xf   :  { %p168_p5 = scmp.ne.s32.totalorder %s31_s18, %s167_s22  ;;  %p173_p7 = scmp.lt.s32.totalorder %s167_s22, %s167_s22 }
  0x11   :  { %p174_p8 = por %p173_p7, %p172_p6 }
  0x13   :  { %p175_p9 = pnand %p174_p8, %p168_p5 }
  0x15   :  { %178 = shalt.err (!%p175_p9)
}
  0x16   :  { %33 = dma.hbm_to_vmem [thread:$0]  %s293_s1, 256, %s31_s18, [#allocation6]  }
  0x17   :  { %239 = dma.done.wait [#allocation3], 256  }
  0x18   :  { %240 = vsyncadd [#allocation3], 4294967040 }
  0x19   :  { %241 = dma.done.wait [#allocation6], 256  }
  0x1a   :  { %242 = vsyncadd [#allocation6], 4294967040  ;;  %v47_v0 = vld [vmem:[#allocation2] sm:$0xff]  ;;  %v59_v1 = vld [vmem:[#allocation2 + $0x8] sm:$0xff]  ;;  %s249_s0 = smov [#allocation8]   ;;  %s250_s25 = smov [#allocation10]  }
  0x1b   :  { %v123_v2 = vmul.f32 -1.442695, %v47_v0  ;;  %v124_v3 = vmul.f32 -1.442695, %v59_v1  ;;  %v48_v4 = vld [vmem:[#allocation5] sm:$0xff]  ;;  %v60_v5 = vld [vmem:[#allocation5 + $0x8] sm:$0xff] }
  0x1c   :  { %v70_v6 = vadd.f32 %v60_v5, %v48_v4  ;;  %s96_s1 = sshll.u32 %s249_s0, 4  ;;  %s106_s26 = sshll.u32 %s250_s25, 4  ;;  %s97_s1 = int_to_ptr.vmem [resolvable:$true] %s96_s1  ;;  %s107_s26 = int_to_ptr.vmem [resolvable:$true] %s106_s26 }
  0x1d   :  { %131 = vpow2.f32 %v123_v2  ;;  %s251_s27 = smov [#allocation7]   ;;  %s179_s29 = scalar_lea.vmem %s97_s1, 128 }
  0x1e   :  { %133 = vpow2.f32 %v124_v3  ;;  %79 = vst [vmem:[#allocation10] sm:$0xff] %v70_v6  ;;  %s86_s28 = sshll.u32 %s251_s27, 4  ;;  %p180_p10 = scmp.ne.s32.totalorder %s97_s1, %s179_s29  ;;  %s87_s28 = int_to_ptr.vmem [resolvable:$true] %s86_s28 }
  0x1f   :  { %p184_p11 = scmp.lt.s32.totalorder %s97_s1, %s97_s1  ;;  %p185_p12 = scmp.lt.s32.totalorder %s179_s29, %s179_s29 }
  0x21   :  { %p186_p13 = por %p185_p12, %p184_p11 }
  0x23   :  { %p187_p0 = pnand %p186_p13, %p180_p10 }
  0x2a   :  { %v132_v7 = vpop.eup %131 }
  0x2b   :  { %v134_v8 = vpop.eup %133  ;;  %v52_v9 = vadd.f32 1.0, %v132_v7 }
  0x2c   :  { %v64_v10 = vadd.f32 1.0, %v134_v8 }
  0x2d   :  { %135 = vrcp.f32 %v52_v9 }
  0x2e   :  { %137 = vrcp.f32 %v64_v10 }
  0x3a   :  { %v136_v11 = vpop.eup %135 }
  0x3b   :  { %v138_v12 = vpop.eup %137  ;;  %v55_v13 = vmul.f32 %v136_v11, %v48_v4 }
  0x3c   :  { %v69_v14 = vadd.f32 %v138_v12, %v136_v11  ;;  %v67_v15 = vmul.f32 %v138_v12, %v60_v5 }
  0x3e   :  { %v68_v16 = vadd.f32 %v67_v15, %v55_v13  ;;  %76 = vst [vmem:[#allocation8] sm:$0xff] %v69_v14 }
  0x3f   :  { %190 = shalt.err (!%p187_p0)
}
  0x40   :  { %99 = dma.vmem_to_hbm [thread:$0]  %s97_s1, 128, %s295_s3, [#allocation9]   ;;  %73 = vst [vmem:[#allocation7] sm:$0xff] %v68_v16 }
  0x41   :  { %s199_s6 = scalar_lea.vmem %s107_s26, 128  ;;  %p204_p2 = scmp.lt.s32.totalorder %s107_s26, %s107_s26 }
  0x42   :  { %p200_p1 = scmp.ne.s32.totalorder %s107_s26, %s199_s6  ;;  %p205_p3 = scmp.lt.s32.totalorder %s199_s6, %s199_s6 }
  0x44   :  { %p206_p4 = por %p205_p3, %p204_p2 }
  0x46   :  { %p207_p5 = pnand %p206_p4, %p200_p1 }
  0x48   :  { %210 = shalt.err (!%p207_p5)
}
  0x49   :  { %109 = dma.vmem_to_hbm [thread:$0]  %s107_s26, 128, %s296_s4, [#allocation9]  }
  0x4a   :  { %s219_s9 = scalar_lea.vmem %s87_s28, 128  ;;  %p224_p7 = scmp.lt.s32.totalorder %s87_s28, %s87_s28 }
  0x4b   :  { %p220_p6 = scmp.ne.s32.totalorder %s87_s28, %s219_s9  ;;  %p225_p8 = scmp.lt.s32.totalorder %s219_s9, %s219_s9 }
  0x4d   :  { %p226_p9 = por %p225_p8, %p224_p7 }
  0x4f   :  { %p227_p10 = pnand %p226_p9, %p220_p6 }
  0x51   :  { %230 = shalt.err (!%p227_p10)
}
  0x52   :  { %89 = dma.vmem_to_hbm [thread:$0]  %s87_s28, 128, %s294_s2, [#allocation4]  }
  0x53   :  { %243 = dma.done.wait [#allocation4], 128  }
  0x54   :  { %244 = vsyncadd [#allocation4], 4294967168 }
  0x55   :  { %245 = dma.done.wait [#allocation9], 256  }
  0x56   :  { %246 = vsyncadd [#allocation9], 4294967040 }
  0x57   :  { %119 = vsyncpa [#allocation3], 1 }
  0x58   :  { %120 = vsyncpa [#allocation6], 1 }
  0x59   :  { %121 = vsyncpa [#allocation4], 1 }
  0x5a   :  { %122 = vsyncpa [#allocation9], 1 }

</bundles_post_ra>
